<compile_context>
chip_gen: v6e
topology: v6e:2x2x1
jax: 0.10.0
libtpu: 0.0.40
codegen_flags: <defaults>
</compile_context>

<pallas_src>
import functools

import jax
import jax.numpy as jnp
from jax.experimental import pallas as pl
from jax.experimental.pallas import tpu as pltpu


_LANE = 128        # lane width (last-dim granularity)
_SUBLANE = 8       # sublane width (second-to-last-dim granularity)
_MIN_SPLIT_ROWS = 128   # once batch >= 2*this, use >=2 row tiles (both v7x TCs busy)
_HAS_BUFFERED = hasattr(pl, "Buffered")


def _round_up(n, m):
    return ((n + m - 1) // m) * m


def _cdiv(a, b):
    return -(-a // b)


# --------------------------------------------------------------------------------------
# Kernel
# --------------------------------------------------------------------------------------
def _mlp_kernel(x_ref, w1_ref, b1_ref, w2_ref, b2_ref, w3_ref, b3_ref, o_ref,
                *, sub_rows, n_sub, bf16_epilogue):
    # Resident weights (bf16) and biases (f32, replicated to 8 sublanes -> take row 0).
    w1 = w1_ref[...]
    w2 = w2_ref[...]
    w3 = w3_ref[...]
    b1 = b1_ref[0:1, :]
    b2 = b2_ref[0:1, :]
    b3 = b3_ref[0:1, :]

    def silu_to_bf16(h):
        # h is the f32 matmul accumulator + f32 bias.
        if bf16_epilogue:
            # v6e/v7x have bf16 VPU/EUP: cast once, do sigmoid+mul in bf16 (halves
            # elementwise traffic and removes the separate post-SiLU cast).
            hb = h.astype(jnp.bfloat16)
            return hb * jax.nn.sigmoid(hb)
        # v5e and older: no bf16 VALU/EUP -> keep SiLU math in f32, cast once at the end.
        return (h * jax.nn.sigmoid(h)).astype(jnp.bfloat16)

    # Statically unrolled sub-tiles: sub-tile s+1's matmuls (MXU / vext slot) overlap
    # sub-tile s's SiLU / cast epilogue (EUP / VPU) inside the same basic block, so the
    # MXU does not idle during the elementwise epilogues.
    for s in range(n_sub):
        r0 = s * sub_rows
        x = x_ref[pl.ds(r0, sub_rows), :].astype(jnp.bfloat16)

        # Layer 1: Linear(dim_in -> hidden) + SiLU
        h = jnp.dot(x, w1, preferred_element_type=jnp.float32) + b1
        h = silu_to_bf16(h)

        # Layer 2: Linear(hidden -> hidden) + SiLU   (depth=2 -> one extra hidden layer)
        h = jnp.dot(h, w2, preferred_element_type=jnp.float32) + b2
        h = silu_to_bf16(h)

        # Output layer: Linear(hidden -> dim_out), no activation
        y = jnp.dot(h, w3, preferred_element_type=jnp.float32) + b3
        o_ref[pl.ds(r0, sub_rows), :] = y.astype(o_ref.dtype)


# --------------------------------------------------------------------------------------
# Parameter init / prep
# --------------------------------------------------------------------------------------
def init_mlp_params(key, dim_in, dim_out, *, expansion_factor=2.0, depth=2):
    """PyTorch-Linear-style init (uniform +-1/sqrt(fan_in)).
    Weights stored as (in_features, out_features) f32; biases as (out_features,) f32."""
    assert depth == 2  # matches the default module configuration implemented in the kernel
    hidden = int(expansion_factor * dim_out)
    ks = jax.random.split(key, 6)

    def linear(kw, kb, fan_in, fan_out):
        bound = 1.0 / (fan_in ** 0.5)
        w = jax.random.uniform(kw, (fan_in, fan_out), jnp.float32, -bound, bound)
        b = jax.random.uniform(kb, (fan_out,), jnp.float32, -bound, bound)
        return w, b

    w1, b1 = linear(ks[0], ks[1], dim_in, hidden)
    w2, b2 = linear(ks[2], ks[3], hidden, hidden)
    w3, b3 = linear(ks[4], ks[5], hidden, dim_out)
    return {"w1": w1, "b1": b1, "w2": w2, "b2": b2, "w3": w3, "b3": b3}


def prepare_mlp_params(params):
    """One-time prep: pad feature dims to multiples of 128 (lane-dense blocks), cast
    weights to bf16, keep biases f32 replicated to a full (8, N) sublane tile.
    Zero padding is exact: padded lanes stay 0 through SiLU and are sliced off."""
    w1, b1 = params["w1"], params["b1"]
    w2, b2 = params["w2"], params["b2"]
    w3, b3 = params["w3"], params["b3"]
    dim_in, hidden = w1.shape
    dim_out = w3.shape[1]
    dim_in_p = _round_up(dim_in, _LANE)
    hidden_p = _round_up(hidden, _LANE)
    dim_out_p = _round_up(dim_out, _LANE)

    def pad_w(w, rp, cp):
        r, c = w.shape
        return jnp.pad(w, ((0, rp - r), (0, cp - c))).astype(jnp.bfloat16)

    def pad_b(b, cp):
        c = b.shape[-1]
        b = jnp.pad(b.reshape(1, c), ((0, 0), (0, cp - c))).astype(jnp.float32)
        return jnp.tile(b, (_SUBLANE, 1))  # (8, cp) full sublane tile

    return {
        "w1": pad_w(w1, dim_in_p, hidden_p), "b1": pad_b(b1, hidden_p),
        "w2": pad_w(w2, hidden_p, hidden_p), "b2": pad_b(b2, hidden_p),
        "w3": pad_w(w3, hidden_p, dim_out_p), "b3": pad_b(b3, dim_out_p),
        "dim_in": dim_in, "dim_out": dim_out,
        "dim_in_p": dim_in_p, "hidden_p": hidden_p, "dim_out_p": dim_out_p,
    }


# --------------------------------------------------------------------------------------
# VMEM budgeting / tiling heuristics
# --------------------------------------------------------------------------------------
def _bf16_epilogue_default():
    try:
        kind = jax.devices()[0].device_kind.lower()
    except Exception:
        return False
    # v5 and older have no bf16 VPU/EUP -> keep the f32 SiLU epilogue there.
    return not any(tag in kind for tag in ("v2", "v3", "v4", "v5"))


def _vmem_capacity_bytes():
    try:
        cap = int(getattr(pltpu.get_tpu_info(), "vmem_capacity_bytes", 0))
        if cap > 0:
            return cap
    except Exception:
        pass
    return 64 * 1024 * 1024   # conservative fallback: v7x per-TensorCore VMEM


def _weight_bias_bytes(dim_in_p, hidden_p, dim_out_p):
    weights = 2 * (dim_in_p * hidden_p + hidden_p * hidden_p + hidden_p * dim_out_p)  # bf16
    biases = 4 * _SUBLANE * (2 * hidden_p + dim_out_p)                                # f32
    return weights + biases


def _estimate_vmem_bytes(block_rows, sub_rows, dim_in_p, hidden_p, dim_out_p,
                         x_itemsize, weight_buffers):
    resident = weight_buffers * _weight_bias_bytes(dim_in_p, hidden_p, dim_out_p)
    io_tiles = 2 * block_rows * (dim_in_p * x_itemsize + dim_out_p * 4)  # double-buffered x / out
    # Per-sub-tile intermediates (bf16 x, f32 acc + bf16 act per hidden layer, f32 y);
    # allow two sub-tiles live at once because of the MXU/epilogue overlap.
    inter = sub_rows * (dim_in_p * 2 + hidden_p * 12 + dim_out_p * 4)
    inter *= min(2, max(1, block_rows // max(sub_rows, 1)))
    return resident + io_tiles + inter


def _choose_row_tiling(batch, requested_rows, dim_in_p, hidden_p, dim_out_p,
                       x_itemsize, budget):
    batch8 = _round_up(batch, _SUBLANE)
    block_rows = max(_SUBLANE, _round_up(min(requested_rows, batch8), _SUBLANE))

    def balance(rows):
        # Near-equal row tiles: padding waste is < 8 rows per tile, never a full tile.
        tiles = _cdiv(batch8, rows)
        if tiles == 1 and batch8 >= 2 * _MIN_SPLIT_ROWS:
            tiles = 2          # both v7x TCs get work; negligible cost on 1-TC chips
        rows = _round_up(_cdiv(batch8, tiles), _SUBLANE)
        return rows, tiles

    def sub_split(rows):
        # Two in-kernel sub-tiles once the row tile is big enough to overlap MXU/epilogue.
        if rows >= 128 and rows % 16 == 0:
            return rows // 2, 2
        return rows, 1

    block_rows, num_tiles = balance(block_rows)
    sub_rows, n_sub = sub_split(block_rows)
    est = _estimate_vmem_bytes(block_rows, sub_rows, dim_in_p, hidden_p, dim_out_p,
                               x_itemsize, weight_buffers=1)
    for _ in range(8):
        if est <= budget or block_rows <= 8 * _SUBLANE:
            break
        smaller = max(_SUBLANE, _round_up(block_rows // 2, _SUBLANE))
        if smaller >= block_rows:
            break
        block_rows, num_tiles = balance(smaller)
        sub_rows, n_sub = sub_split(block_rows)
        est = _estimate_vmem_bytes(block_rows, sub_rows, dim_in_p, hidden_p, dim_out_p,
                                   x_itemsize, weight_buffers=1)
    return block_rows, num_tiles, sub_rows, n_sub, est


# --------------------------------------------------------------------------------------
# Wrapper
# --------------------------------------------------------------------------------------
def mlp_pallas(x, prepared, *, block_rows=512, bf16_epilogue=None):
    """x: (batch, dim_in), any float dtype. prepared: output of prepare_mlp_params.
    Returns (batch, dim_out) f32."""
    batch, dim_in = x.shape
    assert dim_in == prepared["dim_in"], "input feature dim mismatch"
    dim_in_p = prepared["dim_in_p"]
    hidden_p = prepared["hidden_p"]
    dim_out_p = prepared["dim_out_p"]
    dim_out = prepared["dim_out"]

    if bf16_epilogue is None:
        bf16_epilogue = _bf16_epilogue_default()

    cap = _vmem_capacity_bytes()
    budget = cap - (8 << 20)          # leave headroom for Mosaic internal scratch

    x_itemsize = jnp.dtype(x.dtype).itemsize
    block_rows, num_tiles, sub_rows, n_sub, est = _choose_row_tiling(
        batch, block_rows, dim_in_p, hidden_p, dim_out_p, x_itemsize, budget)

    batch_p = num_tiles * block_rows
    if (batch_p, dim_in_p) != (batch, dim_in):
        x = jnp.pad(x, ((0, batch_p - batch), (0, dim_in_p - dim_in)))

    # Scoped-VMEM limit = computed requirement + headroom, clamped below physical VMEM.
    vmem_limit = min(max(int(est * 1.2) + (4 << 20), 32 << 20), budget)

    kernel = functools.partial(_mlp_kernel, sub_rows=sub_rows, n_sub=n_sub,
                               bf16_epilogue=bf16_epilogue)

    def weight_spec(shape, single_buffer):
        # Constant-index operand: fetched once, stays resident in VMEM across the grid.
        if single_buffer:
            return pl.BlockSpec(shape, lambda i: (0, 0), pipeline_mode=pl.Buffered(1))
        return pl.BlockSpec(shape, lambda i: (0, 0))

    def build(single_buffer, limit):
        return pl.pallas_call(
            kernel,
            out_shape=jax.ShapeDtypeStruct((batch_p, dim_out_p), jnp.float32),
            grid_spec=pltpu.PrefetchScalarGridSpec(
                num_scalar_prefetch=0,
                grid=(num_tiles,),
                in_specs=[
                    pl.BlockSpec((block_rows, dim_in_p), lambda i: (i, 0)),  # x row tile
                    weight_spec((dim_in_p, hidden_p), single_buffer),        # w1 (bf16)
                    weight_spec((_SUBLANE, hidden_p), single_buffer),        # b1 (f32)
                    weight_spec((hidden_p, hidden_p), single_buffer),        # w2 (bf16)
                    weight_spec((_SUBLANE, hidden_p), single_buffer),        # b2 (f32)
                    weight_spec((hidden_p, dim_out_p), single_buffer),       # w3 (bf16)
                    weight_spec((_SUBLANE, dim_out_p), single_buffer),       # b3 (f32)
                ],
                out_specs=pl.BlockSpec((block_rows, dim_out_p), lambda i: (i, 0)),
            ),
            compiler_params=pltpu.CompilerParams(
                dimension_semantics=("parallel",),      # shard row tiles across TCs (v7x)
                vmem_limit_bytes=int(limit),
            ),
        )

    args = (x, prepared["w1"], prepared["b1"], prepared["w2"], prepared["b2"],
            prepared["w3"], prepared["b3"])

    if _HAS_BUFFERED:
        try:
            out = build(True, vmem_limit)(*args)
        except Exception:
            # pipeline_mode=Buffered(1) rejected by this JAX build: retry with default
            # (double-buffered) resident weights and a limit grown by the duplicated
            # weight bytes. Errors unrelated to buffering re-surface from this build.
            extra = _weight_bias_bytes(dim_in_p, hidden_p, dim_out_p)
            out = build(False, min(vmem_limit + extra, budget))(*args)
    else:
        extra = _weight_bias_bytes(dim_in_p, hidden_p, dim_out_p)
        out = build(False, min(vmem_limit + extra, budget))(*args)

    return out[:batch, :dim_out]


def mlp_reference(x, p):
    """Plain-JAX f32 reference (PyTorch forward semantics) for correctness check."""
    x = x.astype(jnp.float32)
    h = x @ p["w1"] + p["b1"]
    h = h * jax.nn.sigmoid(h)
    h = h @ p["w2"] + p["b2"]
    h = h * jax.nn.sigmoid(h)
    return h @ p["w3"] + p["b3"]


if __name__ == "__main__":
    key = jax.random.PRNGKey(0)
    k_x, k_x2, k_p = jax.random.split(key, 3)

    dim_in, dim_out = 32, 16   # hidden = int(2.0 * 16) = 32
    raw_params = init_mlp_params(k_p, dim_in, dim_out)
    prepared = prepare_mlp_params(raw_params)

    # Aligned small batch.
    x = jax.random.normal(k_x, (16, dim_in), jnp.float32)
    out = jax.block_until_ready(mlp_pallas(x, prepared))
    ref = mlp_reference(x, raw_params)
    assert out.shape == (16, dim_out)
    max_err = float(jnp.max(jnp.abs(out - ref)))
    assert max_err < 5e-2, f"mismatch vs reference: max abs err {max_err}"

    # Ragged batch: exercises the row-padding / near-equal-tile path.
    x2 = jax.random.normal(k_x2, (20, dim_in), jnp.float32)
    out2 = jax.block_until_ready(mlp_pallas(x2, prepared))
    ref2 = mlp_reference(x2, raw_params)
    assert out2.shape == (20, dim_out)
    max_err2 = float(jnp.max(jnp.abs(out2 - ref2)))
    assert max_err2 < 5e-2, f"ragged-batch mismatch: max abs err {max_err2}"

    print("KERNEL_OK")
</pallas_src>

<mosaic_0001>
module attributes {stable_mosaic.version = 11 : i64} {
  func.func @_mlp_kernel(%arg0: i32, %arg1: memref<16x128xf32, #tpu.memory_space<vmem>>, %arg2: memref<128x128xbf16, #tpu.memory_space<vmem>>, %arg3: memref<8x128xf32, #tpu.memory_space<vmem>>, %arg4: memref<128x128xbf16, #tpu.memory_space<vmem>>, %arg5: memref<8x128xf32, #tpu.memory_space<vmem>>, %arg6: memref<128x128xbf16, #tpu.memory_space<vmem>>, %arg7: memref<8x128xf32, #tpu.memory_space<vmem>>, %arg8: memref<16x128xf32, #tpu.memory_space<vmem>>) attributes {dimension_semantics = [#tpu.dimension_semantics<parallel>], iteration_bounds = array<i64: 1>, scalar_prefetch = 0 : i64, scratch_operands = 0 : i64, tpu.core_type = #tpu.core_type<tc>, window_params = [{transform_indices = @transform_0, window_bounds = array<i64: 16, 128>}, {pipeline_mode = #tpu.pipeline_mode<synchronous>, transform_indices = @transform_1, window_bounds = array<i64: 128, 128>}, {pipeline_mode = #tpu.pipeline_mode<synchronous>, transform_indices = @transform_2, window_bounds = array<i64: 8, 128>}, {pipeline_mode = #tpu.pipeline_mode<synchronous>, transform_indices = @transform_3, window_bounds = array<i64: 128, 128>}, {pipeline_mode = #tpu.pipeline_mode<synchronous>, transform_indices = @transform_4, window_bounds = array<i64: 8, 128>}, {pipeline_mode = #tpu.pipeline_mode<synchronous>, transform_indices = @transform_5, window_bounds = array<i64: 128, 128>}, {pipeline_mode = #tpu.pipeline_mode<synchronous>, transform_indices = @transform_6, window_bounds = array<i64: 8, 128>}, {transform_indices = @transform_7, window_bounds = array<i64: 16, 128>}]} {
    %c0 = arith.constant 0 : index
    %c0_0 = arith.constant 0 : index
    %0 = vector.load %arg2[%c0, %c0_0] : memref<128x128xbf16, #tpu.memory_space<vmem>>, vector<128x128xbf16>
    %c0_1 = arith.constant 0 : index
    %c0_2 = arith.constant 0 : index
    %1 = vector.load %arg4[%c0_1, %c0_2] : memref<128x128xbf16, #tpu.memory_space<vmem>>, vector<128x128xbf16>
    %c0_3 = arith.constant 0 : index
    %c0_4 = arith.constant 0 : index
    %2 = vector.load %arg6[%c0_3, %c0_4] : memref<128x128xbf16, #tpu.memory_space<vmem>>, vector<128x128xbf16>
    %c0_5 = arith.constant 0 : index
    %c0_6 = arith.constant 0 : index
    %3 = vector.load %arg3[%c0_5, %c0_6] : memref<8x128xf32, #tpu.memory_space<vmem>>, vector<1x128xf32>
    %c0_7 = arith.constant 0 : index
    %c0_8 = arith.constant 0 : index
    %4 = vector.load %arg5[%c0_7, %c0_8] : memref<8x128xf32, #tpu.memory_space<vmem>>, vector<1x128xf32>
    %c0_9 = arith.constant 0 : index
    %c0_10 = arith.constant 0 : index
    %5 = vector.load %arg7[%c0_9, %c0_10] : memref<8x128xf32, #tpu.memory_space<vmem>>, vector<1x128xf32>
    %c0_11 = arith.constant 0 : index
    %c0_12 = arith.constant 0 : index
    %6 = vector.load %arg1[%c0_11, %c0_12] : memref<16x128xf32, #tpu.memory_space<vmem>>, vector<16x128xf32>
    %7 = arith.truncf %6 : vector<16x128xf32> to vector<16x128xbf16>
    %cst = arith.constant dense<0.000000e+00> : vector<16x128xf32>
    %8 = tpu.matmul %7, %0, %cst {dimension_numbers = #tpu.dot_dimension_numbers<[1], [0], [0], [1], [0, 0, 1, 1], [], []>} : vector<16x128xbf16>, vector<128x128xbf16>, vector<16x128xf32> -> vector<16x128xf32>
    %9 = vector.broadcast %3 : vector<1x128xf32> to vector<16x128xf32>
    %10 = arith.addf %8, %9 : vector<16x128xf32>
    %11 = arith.truncf %10 : vector<16x128xf32> to vector<16x128xbf16>
    %12 = arith.negf %11 : vector<16x128xbf16>
    %13 = math.exp %12 : vector<16x128xbf16>
    %cst_13 = arith.constant 1.000000e+00 : bf16
    %14 = vector.broadcast %cst_13 : bf16 to vector<16x128xbf16>
    %15 = arith.addf %14, %13 : vector<16x128xbf16>
    %16 = arith.divf %14, %15 : vector<16x128xbf16>
    %17 = arith.mulf %11, %16 : vector<16x128xbf16>
    %cst_14 = arith.constant dense<0.000000e+00> : vector<16x128xf32>
    %18 = tpu.matmul %17, %1, %cst_14 {dimension_numbers = #tpu.dot_dimension_numbers<[1], [0], [0], [1], [0, 0, 1, 1], [], []>} : vector<16x128xbf16>, vector<128x128xbf16>, vector<16x128xf32> -> vector<16x128xf32>
    %19 = vector.broadcast %4 : vector<1x128xf32> to vector<16x128xf32>
    %20 = arith.addf %18, %19 : vector<16x128xf32>
    %21 = arith.truncf %20 : vector<16x128xf32> to vector<16x128xbf16>
    %22 = arith.negf %21 : vector<16x128xbf16>
    %23 = math.exp %22 : vector<16x128xbf16>
    %cst_15 = arith.constant 1.000000e+00 : bf16
    %24 = vector.broadcast %cst_15 : bf16 to vector<16x128xbf16>
    %25 = arith.addf %24, %23 : vector<16x128xbf16>
    %26 = arith.divf %24, %25 : vector<16x128xbf16>
    %27 = arith.mulf %21, %26 : vector<16x128xbf16>
    %cst_16 = arith.constant dense<0.000000e+00> : vector<16x128xf32>
    %28 = tpu.matmul %27, %2, %cst_16 {dimension_numbers = #tpu.dot_dimension_numbers<[1], [0], [0], [1], [0, 0, 1, 1], [], []>} : vector<16x128xbf16>, vector<128x128xbf16>, vector<16x128xf32> -> vector<16x128xf32>
    %29 = vector.broadcast %5 : vector<1x128xf32> to vector<16x128xf32>
    %30 = arith.addf %28, %29 : vector<16x128xf32>
    %c0_17 = arith.constant 0 : index
    %c0_18 = arith.constant 0 : index
    %31 = vector.load %arg8[%c0_17, %c0_18] : memref<16x128xf32, #tpu.memory_space<vmem>>, vector<16x128xf32>
    tpu.vector_store %arg8[%c0_17, %c0_18], %30 {strides = array<i32>} : memref<16x128xf32, #tpu.memory_space<vmem>>, vector<16x128xf32>,
    return
  }
  func.func @transform_0(%arg0: i32) -> (i32, i32) {
    %c0_i32 = arith.constant 0 : i32
    %c0_i32_0 = arith.constant 0 : i32
    return %arg0, %c0_i32 : i32, i32
  }
  func.func @transform_1(%arg0: i32) -> (i32, i32) {
    %c0_i32 = arith.constant 0 : i32
    %c0_i32_0 = arith.constant 0 : i32
    %c0_i32_1 = arith.constant 0 : i32
    return %c0_i32, %c0_i32_0 : i32, i32
  }
  func.func @transform_2(%arg0: i32) -> (i32, i32) {
    %c0_i32 = arith.constant 0 : i32
    %c0_i32_0 = arith.constant 0 : i32
    %c0_i32_1 = arith.constant 0 : i32
    return %c0_i32, %c0_i32_0 : i32, i32
  }
  func.func @transform_3(%arg0: i32) -> (i32, i32) {
    %c0_i32 = arith.constant 0 : i32
    %c0_i32_0 = arith.constant 0 : i32
    %c0_i32_1 = arith.constant 0 : i32
    return %c0_i32, %c0_i32_0 : i32, i32
  }
  func.func @transform_4(%arg0: i32) -> (i32, i32) {
    %c0_i32 = arith.constant 0 : i32
    %c0_i32_0 = arith.constant 0 : i32
    %c0_i32_1 = arith.constant 0 : i32
    return %c0_i32, %c0_i32_0 : i32, i32
  }
  func.func @transform_5(%arg0: i32) -> (i32, i32) {
    %c0_i32 = arith.constant 0 : i32
    %c0_i32_0 = arith.constant 0 : i32
    %c0_i32_1 = arith.constant 0 : i32
    return %c0_i32, %c0_i32_0 : i32, i32
  }
  func.func @transform_6(%arg0: i32) -> (i32, i32) {
    %c0_i32 = arith.constant 0 : i32
    %c0_i32_0 = arith.constant 0 : i32
    %c0_i32_1 = arith.constant 0 : i32
    return %c0_i32, %c0_i32_0 : i32, i32
  }
  func.func @transform_7(%arg0: i32) -> (i32, i32) {
    %c0_i32 = arith.constant 0 : i32
    %c0_i32_0 = arith.constant 0 : i32
    return %arg0, %c0_i32 : i32, i32
  }
}

module attributes {stable_mosaic.version = 11 : i64} {
  func.func @_mlp_kernel(%arg0: i32, %arg1: memref<16x128xf32, #tpu.memory_space<vmem>>, %arg2: memref<128x128xbf16, #tpu.memory_space<vmem>>, %arg3: memref<8x128xf32, #tpu.memory_space<vmem>>, %arg4: memref<128x128xbf16, #tpu.memory_space<vmem>>, %arg5: memref<8x128xf32, #tpu.memory_space<vmem>>, %arg6: memref<128x128xbf16, #tpu.memory_space<vmem>>, %arg7: memref<8x128xf32, #tpu.memory_space<vmem>>, %arg8: memref<16x128xf32, #tpu.memory_space<vmem>>) attributes {dimension_semantics = [#tpu.dimension_semantics<parallel>], iteration_bounds = array<i64: 1>, scalar_prefetch = 0 : i64, scratch_operands = 0 : i64, tpu.core_type = #tpu.core_type<tc>, window_params = [{transform_indices = @transform_0, window_bounds = array<i64: 16, 128>}, {pipeline_mode = #tpu.pipeline_mode<synchronous>, transform_indices = @transform_1, window_bounds = array<i64: 128, 128>}, {pipeline_mode = #tpu.pipeline_mode<synchronous>, transform_indices = @transform_2, window_bounds = array<i64: 8, 128>}, {pipeline_mode = #tpu.pipeline_mode<synchronous>, transform_indices = @transform_3, window_bounds = array<i64: 128, 128>}, {pipeline_mode = #tpu.pipeline_mode<synchronous>, transform_indices = @transform_4, window_bounds = array<i64: 8, 128>}, {pipeline_mode = #tpu.pipeline_mode<synchronous>, transform_indices = @transform_5, window_bounds = array<i64: 128, 128>}, {pipeline_mode = #tpu.pipeline_mode<synchronous>, transform_indices = @transform_6, window_bounds = array<i64: 8, 128>}, {transform_indices = @transform_7, window_bounds = array<i64: 16, 128>}]} {
    %c0 = arith.constant 0 : index
    %c0_0 = arith.constant 0 : index
    %0 = vector.load %arg2[%c0, %c0_0] : memref<128x128xbf16, #tpu.memory_space<vmem>>, vector<128x128xbf16>
    %c0_1 = arith.constant 0 : index
    %c0_2 = arith.constant 0 : index
    %1 = vector.load %arg4[%c0_1, %c0_2] : memref<128x128xbf16, #tpu.memory_space<vmem>>, vector<128x128xbf16>
    %c0_3 = arith.constant 0 : index
    %c0_4 = arith.constant 0 : index
    %2 = vector.load %arg6[%c0_3, %c0_4] : memref<128x128xbf16, #tpu.memory_space<vmem>>, vector<128x128xbf16>
    %c0_5 = arith.constant 0 : index
    %c0_6 = arith.constant 0 : index
    %3 = vector.load %arg3[%c0_5, %c0_6] : memref<8x128xf32, #tpu.memory_space<vmem>>, vector<1x128xf32>
    %c0_7 = arith.constant 0 : index
    %c0_8 = arith.constant 0 : index
    %4 = vector.load %arg5[%c0_7, %c0_8] : memref<8x128xf32, #tpu.memory_space<vmem>>, vector<1x128xf32>
    %c0_9 = arith.constant 0 : index
    %c0_10 = arith.constant 0 : index
    %5 = vector.load %arg7[%c0_9, %c0_10] : memref<8x128xf32, #tpu.memory_space<vmem>>, vector<1x128xf32>
    %c0_11 = arith.constant 0 : index
    %c0_12 = arith.constant 0 : index
    %6 = vector.load %arg1[%c0_11, %c0_12] : memref<16x128xf32, #tpu.memory_space<vmem>>, vector<16x128xf32>
    %7 = arith.truncf %6 : vector<16x128xf32> to vector<16x128xbf16>
    %cst = arith.constant dense<0.000000e+00> : vector<16x128xf32>
    %8 = tpu.matmul %7, %0, %cst {dimension_numbers = #tpu.dot_dimension_numbers<[1], [0], [0], [1], [0, 0, 1, 1], [], []>} : vector<16x128xbf16>, vector<128x128xbf16>, vector<16x128xf32> -> vector<16x128xf32>
    %9 = vector.broadcast %3 : vector<1x128xf32> to vector<16x128xf32>
    %10 = arith.addf %8, %9 : vector<16x128xf32>
    %11 = arith.truncf %10 : vector<16x128xf32> to vector<16x128xbf16>
    %12 = arith.negf %11 : vector<16x128xbf16>
    %13 = math.exp %12 : vector<16x128xbf16>
    %cst_13 = arith.constant 1.000000e+00 : bf16
    %14 = vector.broadcast %cst_13 : bf16 to vector<16x128xbf16>
    %15 = arith.addf %14, %13 : vector<16x128xbf16>
    %16 = arith.divf %14, %15 : vector<16x128xbf16>
    %17 = arith.mulf %11, %16 : vector<16x128xbf16>
    %cst_14 = arith.constant dense<0.000000e+00> : vector<16x128xf32>
    %18 = tpu.matmul %17, %1, %cst_14 {dimension_numbers = #tpu.dot_dimension_numbers<[1], [0], [0], [1], [0, 0, 1, 1], [], []>} : vector<16x128xbf16>, vector<128x128xbf16>, vector<16x128xf32> -> vector<16x128xf32>
    %19 = vector.broadcast %4 : vector<1x128xf32> to vector<16x128xf32>
    %20 = arith.addf %18, %19 : vector<16x128xf32>
    %21 = arith.truncf %20 : vector<16x128xf32> to vector<16x128xbf16>
    %22 = arith.negf %21 : vector<16x128xbf16>
    %23 = math.exp %22 : vector<16x128xbf16>
    %cst_15 = arith.constant 1.000000e+00 : bf16
    %24 = vector.broadcast %cst_15 : bf16 to vector<16x128xbf16>
    %25 = arith.addf %24, %23 : vector<16x128xbf16>
    %26 = arith.divf %24, %25 : vector<16x128xbf16>
    %27 = arith.mulf %21, %26 : vector<16x128xbf16>
    %cst_16 = arith.constant dense<0.000000e+00> : vector<16x128xf32>
    %28 = tpu.matmul %27, %2, %cst_16 {dimension_numbers = #tpu.dot_dimension_numbers<[1], [0], [0], [1], [0, 0, 1, 1], [], []>} : vector<16x128xbf16>, vector<128x128xbf16>, vector<16x128xf32> -> vector<16x128xf32>
    %29 = vector.broadcast %5 : vector<1x128xf32> to vector<16x128xf32>
    %30 = arith.addf %28, %29 : vector<16x128xf32>
    %c0_17 = arith.constant 0 : index
    %c0_18 = arith.constant 0 : index
    %31 = vector.load %arg8[%c0_17, %c0_18] : memref<16x128xf32, #tpu.memory_space<vmem>>, vector<16x128xf32>
    tpu.vector_store %arg8[%c0_17, %c0_18], %30 {strides = array<i32>} : memref<16x128xf32, #tpu.memory_space<vmem>>, vector<16x128xf32>,
    return
  }
  func.func @transform_0(%arg0: i32) -> (i32, i32) {
    %c0_i32 = arith.constant 0 : i32
    %c0_i32_0 = arith.constant 0 : i32
    return %arg0, %c0_i32 : i32, i32
  }
  func.func @transform_1(%arg0: i32) -> (i32, i32) {
    %c0_i32 = arith.constant 0 : i32
    %c0_i32_0 = arith.constant 0 : i32
    %c0_i32_1 = arith.constant 0 : i32
    return %c0_i32, %c0_i32_0 : i32, i32
  }
  func.func @transform_2(%arg0: i32) -> (i32, i32) {
    %c0_i32 = arith.constant 0 : i32
    %c0_i32_0 = arith.constant 0 : i32
    %c0_i32_1 = arith.constant 0 : i32
    return %c0_i32, %c0_i32_0 : i32, i32
  }
  func.func @transform_3(%arg0: i32) -> (i32, i32) {
    %c0_i32 = arith.constant 0 : i32
    %c0_i32_0 = arith.constant 0 : i32
    %c0_i32_1 = arith.constant 0 : i32
    return %c0_i32, %c0_i32_0 : i32, i32
  }
  func.func @transform_4(%arg0: i32) -> (i32, i32) {
    %c0_i32 = arith.constant 0 : i32
    %c0_i32_0 = arith.constant 0 : i32
    %c0_i32_1 = arith.constant 0 : i32
    return %c0_i32, %c0_i32_0 : i32, i32
  }
  func.func @transform_5(%arg0: i32) -> (i32, i32) {
    %c0_i32 = arith.constant 0 : i32
    %c0_i32_0 = arith.constant 0 : i32
    %c0_i32_1 = arith.constant 0 : i32
    return %c0_i32, %c0_i32_0 : i32, i32
  }
  func.func @transform_6(%arg0: i32) -> (i32, i32) {
    %c0_i32 = arith.constant 0 : i32
    %c0_i32_0 = arith.constant 0 : i32
    %c0_i32_1 = arith.constant 0 : i32
    return %c0_i32, %c0_i32_0 : i32, i32
  }
  func.func @transform_7(%arg0: i32) -> (i32, i32) {
    %c0_i32 = arith.constant 0 : i32
    %c0_i32_0 = arith.constant 0 : i32
    return %arg0, %c0_i32 : i32, i32
  }
}

</mosaic_0001>

<bundles_post_ra>
// kernel: tpu_custom_call.1
= control target key start
LH: loop header
LB: loop body
LE: loop exit
PB: predicated region body
PF: predicated region fallthrough
CT: control target
= control target key end

     0   :  { %12 = vsyncpa [#allocation3], 0  ;;  %s913_s0 = inlined_call_operand.hbm [shape: f32[16,128], index: 0, kind: input, shape index: {}]   ;;  %s914_s1 = inlined_call_operand.hbm [shape: bf16[128,128], index: 1, kind: input, shape index: {}]   ;;  %s915_s2 = inlined_call_operand.hbm [shape: f32[8,128], index: 2, kind: input, shape index: {}]   ;;  %s916_s3 = inlined_call_operand.hbm [shape: bf16[128,128], index: 3, kind: input, shape index: {}]   ;;  %s917_s4 = inlined_call_operand.hbm [shape: f32[8,128], index: 4, kind: input, shape index: {}]   ;;  %s918_s5 = inlined_call_operand.hbm [shape: bf16[128,128], index: 5, kind: input, shape index: {}]   ;;  %s919_s6 = inlined_call_operand.vmem [shape: f32[8,128], index: 6, kind: input, shape index: {}]   ;;  %s920_s7 = inlined_call_operand.hbm [shape: f32[16,128], index: 7, kind: output, shape index: {}]  }
   0x1   :  { %13 = vsyncpa [#allocation6], 0 }
   0x2   :  { %14 = vsyncpa [#allocation9], 0 }
   0x3   :  { %15 = vsyncpa [#allocation12], 0 }
   0x4   :  { %16 = vsyncpa [#allocation4], 0  ;;  %s791_s24 = smov [#allocation5]  }
   0x5   :  { %s34_s25 = sshll.u32 %s791_s24, 4  ;;  %s35_s25 = int_to_ptr.vmem [resolvable:$true] %s34_s25 }
   0x6   :  { %s649_s26 = scalar_lea.vmem %s35_s25, 1024  ;;  %p654_p1 = scmp.lt.s32.totalorder %s35_s25, %s35_s25 }
   0x7   :  { %p650_p0 = scmp.ne.s32.totalorder %s35_s25, %s649_s26  ;;  %p655_p2 = scmp.lt.s32.totalorder %s649_s26, %s649_s26 }
   0x9   :  { %p656_p3 = por %p655_p2, %p654_p1 }
   0xb   :  { %p657_p4 = pnand %p656_p3, %p650_p0 }
   0xd   :  { %660 = shalt.err (!%p657_p4)
}
   0xe   :  { %s792_s27 = smov 64   ;;  %s793_s28 = smov 4  }
   0xf   :  { %40 = dma.hbm_to_vmem [thread:$0]  %s914_s1, 1024, %s35_s25, [#allocation6], %s792_s27, %s792_s27, %s793_s28  }
  0x10   :  { %s794_s8 = smov [#allocation8]   ;;  %s795_s10 = smov [#allocation2]  }
  0x11   :  { %s56_s9 = sshll.u32 %s794_s8, 4  ;;  %s22_s11 = sshll.u32 %s795_s10, 4  ;;  %s57_s9 = int_to_ptr.vmem [resolvable:$true] %s56_s9  ;;  %s23_s11 = int_to_ptr.vmem [resolvable:$true] %s22_s11 }
  0x12   :  { %s669_s12 = scalar_lea.vmem %s57_s9, 1024  ;;  %p674_p6 = scmp.lt.s32.totalorder %s57_s9, %s57_s9 }
  0x13   :  { %p670_p5 = scmp.ne.s32.totalorder %s57_s9, %s669_s12  ;;  %p675_p7 = scmp.lt.s32.totalorder %s669_s12, %s669_s12 }
  0x15   :  { %p676_p8 = por %p675_p7, %p674_p6 }
  0x17   :  { %p677_p9 = pnand %p676_p8, %p670_p5 }
  0x19   :  { %680 = shalt.err (!%p677_p9)
}
  0x1a   :  { %62 = dma.hbm_to_vmem [thread:$0]  %s916_s3, 1024, %s57_s9, [#allocation9], %s792_s27, %s792_s27, %s793_s28  }
  0x1b   :  { %s689_s1 = scalar_lea.vmem %s23_s11, 256  ;;  %p694_p11 = scmp.lt.s32.totalorder %s23_s11, %s23_s11 }
  0x1c   :  { %p690_p10 = scmp.ne.s32.totalorder %s23_s11, %s689_s1  ;;  %p695_p12 = scmp.lt.s32.totalorder %s689_s1, %s689_s1 }
  0x1e   :  { %p696_p13 = por %p695_p12, %p694_p11 }
  0x20   :  { %p697_p0 = pnand %p696_p13, %p690_p10 }
  0x22   :  { %700 = shalt.err (!%p697_p0)
}
  0x23   :  { %s796_s15 = smov 128   ;;  %s797_s16 = smov 8  }
  0x24   :  { %28 = dma.hbm_to_vmem [thread:$0]  %s913_s0, 256, %s23_s11, [#allocation3], %s796_s15, %s796_s15, %s797_s16  }
  0x25   :  { %s798_s19 = smov [#allocation7]   ;;  %s799_s3 = smov [#allocation10]  }
  0x26   :  { %s47_s20 = sshll.u32 %s798_s19, 4  ;;  %s69_s21 = sshll.u32 %s799_s3, 4  ;;  %s48_s20 = int_to_ptr.vmem [resolvable:$true] %s47_s20  ;;  %s70_s21 = int_to_ptr.vmem [resolvable:$true] %s69_s21 }
  0x27   :  { %s709_s22 = scalar_lea.vmem %s48_s20, 128  ;;  %p714_p2 = scmp.lt.s32.totalorder %s48_s20, %s48_s20 }
  0x28   :  { %p710_p1 = scmp.ne.s32.totalorder %s48_s20, %s709_s22  ;;  %p715_p3 = scmp.lt.s32.totalorder %s709_s22, %s709_s22 }
  0x2a   :  { %p716_p4 = por %p715_p3, %p714_p2 }
  0x2c   :  { %p717_p5 = pnand %p716_p4, %p710_p1 }
  0x2e   :  { %720 = shalt.err (!%p717_p5)
}
  0x2f   :  { %50 = dma.hbm_to_vmem [thread:$0]  %s915_s2, 128, %s48_s20, [#allocation6]  }
  0x30   :  { %s729_s25 = scalar_lea.vmem %s70_s21, 128  ;;  %p734_p7 = scmp.lt.s32.totalorder %s70_s21, %s70_s21 }
  0x31   :  { %p730_p6 = scmp.ne.s32.totalorder %s70_s21, %s729_s25  ;;  %p735_p8 = scmp.lt.s32.totalorder %s729_s25, %s729_s25 }
  0x33   :  { %p736_p9 = por %p735_p8, %p734_p7 }
  0x35   :  { %p737_p10 = pnand %p736_p9, %p730_p6 }
  0x37   :  { %740 = shalt.err (!%p737_p10)
}
  0x38   :  { %72 = dma.hbm_to_vmem [thread:$0]  %s917_s4, 128, %s70_s21, [#allocation9]  }
  0x39   :  { %s800_s29 = smov [#allocation11]  }
  0x3a   :  { %s78_s30 = sshll.u32 %s800_s29, 4  ;;  %s79_s30 = int_to_ptr.vmem [resolvable:$true] %s78_s30 }
  0x3b   :  { %s749_s8 = scalar_lea.vmem %s79_s30, 1024  ;;  %p754_p12 = scmp.lt.s32.totalorder %s79_s30, %s79_s30 }
  0x3c   :  { %p750_p11 = scmp.ne.s32.totalorder %s79_s30, %s749_s8  ;;  %p755_p13 = scmp.lt.s32.totalorder %s749_s8, %s749_s8 }
  0x3e   :  { %p756_p0 = por %p755_p13, %p754_p12 }
  0x40   :  { %p757_p1 = pnand %p756_p0, %p750_p11 }
  0x42   :  { %760 = shalt.err (!%p757_p1)
}
  0x43   :  { %84 = dma.hbm_to_vmem [thread:$0]  %s918_s5, 1024, %s79_s30, [#allocation12], %s792_s27, %s792_s27, %s793_s28  }
  0x44   :  { %781 = dma.done.wait [#allocation3], 256  }
  0x45   :  { %782 = vsyncadd [#allocation3], 4294967040 }
  0x46   :  { %783 = dma.done.wait [#allocation6], 1152  }
  0x47   :  { %784 = vsyncadd [#allocation6], 4294966144 }
  0x48   :  { %785 = dma.done.wait [#allocation9], 1152  }
  0x49   :  { %786 = vsyncadd [#allocation9], 4294966144 }
  0x4a   :  { %787 = dma.done.wait [#allocation12], 1024  }
  0x4b   :  { %788 = vsyncadd [#allocation12], 4294966272  ;;  %v801_v0 = vmov 0.0   ;;  %vm802_vm0 = vmmov 0   ;;  %v609_v1 = vld [vmem:[#allocation5 + $0x38] sm:$0xff]   ;;  %v610_v2 = vld [vmem:[#allocation5 + $0x30] sm:$0xff]  }
  0x4c   :  { %536 = vmatprep.subr.bf16.mxu0 %v801_v0  ;;  %552 = vmatprep.mubr.msk.bf16.mxu0 %vm802_vm0, %v801_v0  ;;  %v611_v3 = vld [vmem:[#allocation5 + $0x28] sm:$0xff]   ;;  %v612_v4 = vld [vmem:[#allocation5 + $0x20] sm:$0xff]   ;;  %v613_v5 = vld [vmem:[#allocation5 + $0x18] sm:$0xff]   ;;  %s803_s27 = smov [#allocation13]  }
  0x4d   :  { %556 = vmatprep.subr.bf16.mxu1 %v801_v0  ;;  %572 = vmatprep.mubr.msk.bf16.mxu1 %vm802_vm0, %v801_v0  ;;  %v614_v6 = vld [vmem:[#allocation5 + $0x10] sm:$0xff]   ;;  %v615_v7 = vld [vmem:[#allocation5 + $0x8] sm:$0xff]   ;;  %v616_v8 = vld [vmem:[#allocation5] sm:$0xff]   ;;  %s465_s28 = sshll.u32 %s803_s27, 4  ;;  %s466_s28 = int_to_ptr.vmem [resolvable:$true] %s465_s28 }
  0x4e   :  { %537 = vmatpush3.bf16.msra.mxu0 %v609_v1  ;;  %v158_v9 = vld [vmem:[#allocation2] sm:$0xff]  ;;  %v159_v10 = vld [vmem:[#allocation2 + $0x8] sm:$0xff]  ;;  %v617_v12 = vld [vmem:[#allocation8 + $0x38] sm:$0xff]   ;;  %s761_s10 = scalar_lea.vmem %s466_s28, 256  ;;  %p766_p3 = scmp.lt.s32.totalorder %s466_s28, %s466_s28 }
  0x4f   :  { %538 = vmatprep.subr.bf16.mxu0 %v801_v0  ;;  %v160_v11 = vpack.c.bf16 %v159_v10, %v158_v9  ;;  %557 = vmatpush3.bf16.msra.mxu1 %v617_v12  ;;  %v618_v13 = vld [vmem:[#allocation8 + $0x30] sm:$0xff]   ;;  %v619_v14 = vld [vmem:[#allocation8 + $0x28] sm:$0xff]   ;;  %v620_v15 = vld [vmem:[#allocation8 + $0x20] sm:$0xff]   ;;  %p762_p2 = scmp.ne.s32.totalorder %s466_s28, %s761_s10  ;;  %p767_p4 = scmp.lt.s32.totalorder %s761_s10, %s761_s10 }
  0x50   :  { %558 = vmatprep.subr.bf16.mxu1 %v801_v0  ;;  %v621_v16 = vld [vmem:[#allocation8 + $0x18] sm:$0xff]   ;;  %v622_v17 = vld [vmem:[#allocation8 + $0x10] sm:$0xff]   ;;  %v623_v18 = vld [vmem:[#allocation8 + $0x8] sm:$0xff]  }
  0x51   :  { %v624_v19 = vld [vmem:[#allocation8] sm:$0xff]   ;;  %v480_v21 = vld [vmem:[#allocation7] ss:$0 sm:$0xff]  ;;  %v627_v36 = vld [vmem:[#allocation11 + $0x28] sm:$0xff]   ;;  %p768_p5 = por %p767_p4, %p766_p3 }
  0x52   :  { %539 = vmatpush3.bf16.msra.mxu0 %v610_v2  ;;  %v625_v34 = vld [vmem:[#allocation11 + $0x38] sm:$0xff]   ;;  %v626_v35 = vld [vmem:[#allocation11 + $0x30] sm:$0xff]   ;;  %v628_v37 = vld [vmem:[#allocation11 + $0x20] sm:$0xff]  }
  0x53   :  { %540 = vmatprep.subr.bf16.mxu0 %v801_v0  ;;  %559 = vmatpush3.bf16.msra.mxu1 %v618_v13  ;;  %v629_v38 = vld [vmem:[#allocation11 + $0x18] sm:$0xff]   ;;  %v630_v39 = vld [vmem:[#allocation11 + $0x10] sm:$0xff]   ;;  %v631_v40 = vld [vmem:[#allocation11 + $0x8] sm:$0xff]   ;;  %p769_p6 = pnand %p768_p5, %p762_p2 }
  0x54   :  { %560 = vmatprep.subr.bf16.mxu1 %v801_v0  ;;  %v632_v41 = vld [vmem:[#allocation11] sm:$0xff]   ;;  %v490_v43 = vld [vmem:[#allocation10] ss:$0 sm:$0xff] }
  0x55   :  { %v500_v56 = vld [vmem:[%s919_s6] ss:$0 sm:$0xff] }
  0x56   :  { %541 = vmatpush3.bf16.msra.mxu0 %v611_v3 }
  0x57   :  { %542 = vmatprep.subr.bf16.mxu0 %v801_v0  ;;  %561 = vmatpush3.bf16.msra.mxu1 %v619_v14 }
  0x58   :  { %562 = vmatprep.subr.bf16.mxu1 %v801_v0 }
  0x5a   :  { %543 = vmatpush3.bf16.msra.mxu0 %v612_v4 }
  0x5b   :  { %544 = vmatprep.subr.bf16.mxu0 %v801_v0  ;;  %563 = vmatpush3.bf16.msra.mxu1 %v620_v15 }
  0x5c   :  { %564 = vmatprep.subr.bf16.mxu1 %v801_v0 }
  0x5e   :  { %545 = vmatpush3.bf16.msra.mxu0 %v613_v5 }
  0x5f   :  { %546 = vmatprep.subr.bf16.mxu0 %v801_v0  ;;  %565 = vmatpush3.bf16.msra.mxu1 %v621_v16 }
  0x60   :  { %566 = vmatprep.subr.bf16.mxu1 %v801_v0 }
  0x62   :  { %547 = vmatpush3.bf16.msra.mxu0 %v614_v6 }
  0x63   :  { %548 = vmatprep.subr.bf16.mxu0 %v801_v0  ;;  %567 = vmatpush3.bf16.msra.mxu1 %v622_v17 }
  0x64   :  { %568 = vmatprep.subr.bf16.mxu1 %v801_v0 }
  0x66   :  { %549 = vmatpush3.bf16.msra.mxu0 %v615_v7 }
  0x67   :  { %550 = vmatprep.subr.bf16.mxu0 %v801_v0  ;;  %569 = vmatpush3.bf16.msra.mxu1 %v623_v18 }
  0x68   :  { %570 = vmatprep.subr.bf16.mxu1 %v801_v0 }
  0x6a   :  { %551 = vmatpush3.bf16.msra.mxu0 %v616_v8 }
  0x6b   :  { %576 = vmatprep.subr.bf16.mxu0 %v801_v0  ;;  %571 = vmatpush3.bf16.msra.mxu1 %v624_v19 }
  0x6d   :  { %553 = vmatmul.mubr.bf16.vlgmr.msra.gmra.mxu0 %v160_v11 }
  0x6e   :  { %592 = vmatprep.mubr.msk.bf16.mxu0 %vm802_vm0, %v801_v0  ;;  %577 = vmatpush3.bf16.msra.mxu0 %v625_v34 }
  0x6f   :  { %578 = vmatprep.subr.bf16.mxu0 %v801_v0 }
  0x72   :  { %579 = vmatpush3.bf16.msra.mxu0 %v626_v35 }
  0x73   :  { %580 = vmatprep.subr.bf16.mxu0 %v801_v0 }
  0x76   :  { %581 = vmatpush3.bf16.msra.mxu0 %v627_v36 }
  0x77   :  { %582 = vmatprep.subr.bf16.mxu0 %v801_v0 }
  0x7a   :  { %583 = vmatpush3.bf16.msra.mxu0 %v628_v37 }
  0x7b   :  { %584 = vmatprep.subr.bf16.mxu0 %v801_v0 }
  0x7e   :  { %585 = vmatpush3.bf16.msra.mxu0 %v629_v38 }
  0x7f   :  { %586 = vmatprep.subr.bf16.mxu0 %v801_v0 }
  0x82   :  { %587 = vmatpush3.bf16.msra.mxu0 %v630_v39 }
  0x83   :  { %588 = vmatprep.subr.bf16.mxu0 %v801_v0 }
  0x86   :  { %589 = vmatpush3.bf16.msra.mxu0 %v631_v40 }
  0x87   :  { %590 = vmatprep.subr.bf16.mxu0 %v801_v0 }
  0x8a   :  { %591 = vmatpush3.bf16.msra.mxu0 %v632_v41 }
 0x12d   :  { %v247_v20 = vpop.f32.mrf.mxu0 }
 0x12e   :  { %v248_v24 = vadd.f32 %v480_v21, %v247_v20 }
 0x12f   :  { %v554_v22 = vpop.f32.mrf.mxu0 }
 0x131   :  { %v250_v23 = vpop.f32.mrf.mxu0 }
 0x132   :  { %v251_v25 = vadd.f32 %v480_v21, %v250_v23 }
 0x133   :  { %v555_v26 = vpop.f32.mrf.mxu0 }
 0x134   :  { %v254_v27 = vpack.c.bf16 %v251_v25, %v248_v24 }
 0x136   :  { %v489_v28 = vmul.bf16 3216621497, %v254_v27 }
 0x138   :  { %633 = vpow.bf16 %v489_v28 }
 0x146   :  { %v634_v29 = vpop.eup %633 }
 0x147   :  { %v259_v30 = vadd.bf16 1065369472, %v634_v29 }
 0x149   :  { %635 = vrcp.bf16 %v259_v30 }
 0x157   :  { %v636_v31 = vpop.eup %635 }
 0x158   :  { %v261_v32 = vmul.bf16 1065369472, %v636_v31 }
 0x15a   :  { %v262_v33 = vmul.bf16 %v261_v32, %v254_v27 }
 0x15c   :  { %573 = vmatmul.mubr.bf16.vlgmr.msra.gmra.mxu1 %v262_v33 }
 0x21c   :  { %v349_v42 = vpop.f32.mrf.mxu1 }
 0x21d   :  { %v350_v46 = vadd.f32 %v490_v43, %v349_v42 }
 0x21e   :  { %v574_v44 = vpop.f32.mrf.mxu1 }
 0x220   :  { %v352_v45 = vpop.f32.mrf.mxu1 }
 0x221   :  { %v353_v47 = vadd.f32 %v490_v43, %v352_v45 }
 0x222   :  { %v575_v48 = vpop.f32.mrf.mxu1 }
 0x223   :  { %v356_v49 = vpack.c.bf16 %v353_v47, %v350_v46 }
 0x225   :  { %v499_v50 = vmul.bf16 3216621497, %v356_v49 }
 0x227   :  { %637 = vpow.bf16 %v499_v50 }
 0x235   :  { %v638_v51 = vpop.eup %637 }
 0x236   :  { %v361_v52 = vadd.bf16 1065369472, %v638_v51 }
 0x238   :  { %639 = vrcp.bf16 %v361_v52 }
 0x246   :  { %v640_v53 = vpop.eup %639 }
 0x247   :  { %v363_v54 = vmul.bf16 1065369472, %v640_v53 }
 0x249   :  { %v364_v55 = vmul.bf16 %v363_v54, %v356_v49 }
 0x24b   :  { %593 = vmatmul.mubr.bf16.vlgmr.msra.gmra.mxu0 %v364_v55 }
 0x30b   :  { %v451_v57 = vpop.f32.mrf.mxu0 }
 0x30c   :  { %v452_v58 = vadd.f32 %v500_v56, %v451_v57 }
 0x30d   :  { %v594_v59 = vpop.f32.mrf.mxu0 }
 0x30e   :  { %458 = vst [vmem:[#allocation13] sm:$0xff] %v452_v58 }
 0x30f   :  { %v454_v60 = vpop.f32.mrf.mxu0 }
 0x310   :  { %v455_v61 = vadd.f32 %v500_v56, %v454_v60 }
 0x311   :  { %v595_v62 = vpop.f32.mrf.mxu0 }
 0x312   :  { %459 = vst [vmem:[#allocation13 + $0x8] sm:$0xff] %v455_v61 }
 0x313   :  { %772 = shalt.err (!%p769_p6)
}
 0x314   :  { %471 = dma.vmem_to_hbm [thread:$0]  %s466_s28, 256, %s920_s7, [#allocation4], %s796_s15, %s796_s15, %s797_s16  }
 0x315   :  { %789 = dma.done.wait [#allocation4], 256  }
 0x316   :  { %790 = vsyncadd [#allocation4], 4294967040 }
 0x317   :  { %475 = vsyncpa [#allocation3], 1 }
 0x318   :  { %476 = vsyncpa [#allocation6], 1 }
 0x319   :  { %477 = vsyncpa [#allocation9], 1 }
 0x31a   :  { %478 = vsyncpa [#allocation12], 1 }
 0x31b   :  { %479 = vsyncpa [#allocation4], 1 }

// kernel: tpu_custom_call.1
= control target key start
LH: loop header
LB: loop body
LE: loop exit
PB: predicated region body
PF: predicated region fallthrough
CT: control target
= control target key end

     0   :  { %12 = vsyncpa [#allocation3], 0  ;;  %s913_s0 = inlined_call_operand.hbm [shape: f32[16,128], index: 0, kind: input, shape index: {}]   ;;  %s914_s1 = inlined_call_operand.hbm [shape: bf16[128,128], index: 1, kind: input, shape index: {}]   ;;  %s915_s2 = inlined_call_operand.hbm [shape: f32[8,128], index: 2, kind: input, shape index: {}]   ;;  %s916_s3 = inlined_call_operand.hbm [shape: bf16[128,128], index: 3, kind: input, shape index: {}]   ;;  %s917_s4 = inlined_call_operand.hbm [shape: f32[8,128], index: 4, kind: input, shape index: {}]   ;;  %s918_s5 = inlined_call_operand.hbm [shape: bf16[128,128], index: 5, kind: input, shape index: {}]   ;;  %s919_s6 = inlined_call_operand.vmem [shape: f32[8,128], index: 6, kind: input, shape index: {}]   ;;  %s920_s7 = inlined_call_operand.hbm [shape: f32[16,128], index: 7, kind: output, shape index: {}]  }
   0x1   :  { %13 = vsyncpa [#allocation6], 0 }
   0x2   :  { %14 = vsyncpa [#allocation9], 0 }
   0x3   :  { %15 = vsyncpa [#allocation12], 0 }
   0x4   :  { %16 = vsyncpa [#allocation4], 0  ;;  %s791_s24 = smov [#allocation5]  }
   0x5   :  { %s34_s25 = sshll.u32 %s791_s24, 4  ;;  %s35_s25 = int_to_ptr.vmem [resolvable:$true] %s34_s25 }
   0x6   :  { %s649_s26 = scalar_lea.vmem %s35_s25, 1024  ;;  %p654_p1 = scmp.lt.s32.totalorder %s35_s25, %s35_s25 }
   0x7   :  { %p650_p0 = scmp.ne.s32.totalorder %s35_s25, %s649_s26  ;;  %p655_p2 = scmp.lt.s32.totalorder %s649_s26, %s649_s26 }
   0x9   :  { %p656_p3 = por %p655_p2, %p654_p1 }
   0xb   :  { %p657_p4 = pnand %p656_p3, %p650_p0 }
   0xd   :  { %660 = shalt.err (!%p657_p4)
}
   0xe   :  { %s792_s27 = smov 64   ;;  %s793_s28 = smov 4  }
   0xf   :  { %40 = dma.hbm_to_vmem [thread:$0]  %s914_s1, 1024, %s35_s25, [#allocation6], %s792_s27, %s792_s27, %s793_s28  }
  0x10   :  { %s794_s8 = smov [#allocation8]   ;;  %s795_s10 = smov [#allocation2]  }
  0x11   :  { %s56_s9 = sshll.u32 %s794_s8, 4  ;;  %s22_s11 = sshll.u32 %s795_s10, 4  ;;  %s57_s9 = int_to_ptr.vmem [resolvable:$true] %s56_s9  ;;  %s23_s11 = int_to_ptr.vmem [resolvable:$true] %s22_s11 }
  0x12   :  { %s669_s12 = scalar_lea.vmem %s57_s9, 1024  ;;  %p674_p6 = scmp.lt.s32.totalorder %s57_s9, %s57_s9 }
  0x13   :  { %p670_p5 = scmp.ne.s32.totalorder %s57_s9, %s669_s12  ;;  %p675_p7 = scmp.lt.s32.totalorder %s669_s12, %s669_s12 }
  0x15   :  { %p676_p8 = por %p675_p7, %p674_p6 }
  0x17   :  { %p677_p9 = pnand %p676_p8, %p670_p5 }
  0x19   :  { %680 = shalt.err (!%p677_p9)
}
  0x1a   :  { %62 = dma.hbm_to_vmem [thread:$0]  %s916_s3, 1024, %s57_s9, [#allocation9], %s792_s27, %s792_s27, %s793_s28  }
  0x1b   :  { %s689_s1 = scalar_lea.vmem %s23_s11, 256  ;;  %p694_p11 = scmp.lt.s32.totalorder %s23_s11, %s23_s11 }
  0x1c   :  { %p690_p10 = scmp.ne.s32.totalorder %s23_s11, %s689_s1  ;;  %p695_p12 = scmp.lt.s32.totalorder %s689_s1, %s689_s1 }
  0x1e   :  { %p696_p13 = por %p695_p12, %p694_p11 }
  0x20   :  { %p697_p0 = pnand %p696_p13, %p690_p10 }
  0x22   :  { %700 = shalt.err (!%p697_p0)
}
  0x23   :  { %s796_s15 = smov 128   ;;  %s797_s16 = smov 8  }
  0x24   :  { %28 = dma.hbm_to_vmem [thread:$0]  %s913_s0, 256, %s23_s11, [#allocation3], %s796_s15, %s796_s15, %s797_s16  }
  0x25   :  { %s798_s19 = smov [#allocation7]   ;;  %s799_s3 = smov [#allocation10]  }
  0x26   :  { %s47_s20 = sshll.u32 %s798_s19, 4  ;;  %s69_s21 = sshll.u32 %s799_s3, 4  ;;  %s48_s20 = int_to_ptr.vmem [resolvable:$true] %s47_s20  ;;  %s70_s21 = int_to_ptr.vmem [resolvable:$true] %s69_s21 }
  0x27   :  { %s709_s22 = scalar_lea.vmem %s48_s20, 128  ;;  %p714_p2 = scmp.lt.s32.totalorder %s48_s20, %s48_s20 }
  0x28   :  { %p710_p1 = scmp.ne.s32.totalorder %s48_s20, %s709_s22  ;;  %p715_p3 = scmp.lt.s32.totalorder %s709_s22, %s709_s22 }
  0x2a   :  { %p716_p4 = por %p715_p3, %p714_p2 }
  0x2c   :  { %p717_p5 = pnand %p716_p4, %p710_p1 }
  0x2e   :  { %720 = shalt.err (!%p717_p5)
}
  0x2f   :  { %50 = dma.hbm_to_vmem [thread:$0]  %s915_s2, 128, %s48_s20, [#allocation6]  }
  0x30   :  { %s729_s25 = scalar_lea.vmem %s70_s21, 128  ;;  %p734_p7 = scmp.lt.s32.totalorder %s70_s21, %s70_s21 }
  0x31   :  { %p730_p6 = scmp.ne.s32.totalorder %s70_s21, %s729_s25  ;;  %p735_p8 = scmp.lt.s32.totalorder %s729_s25, %s729_s25 }
  0x33   :  { %p736_p9 = por %p735_p8, %p734_p7 }
  0x35   :  { %p737_p10 = pnand %p736_p9, %p730_p6 }
  0x37   :  { %740 = shalt.err (!%p737_p10)
}
  0x38   :  { %72 = dma.hbm_to_vmem [thread:$0]  %s917_s4, 128, %s70_s21, [#allocation9]  }
  0x39   :  { %s800_s29 = smov [#allocation11]  }
  0x3a   :  { %s78_s30 = sshll.u32 %s800_s29, 4  ;;  %s79_s30 = int_to_ptr.vmem [resolvable:$true] %s78_s30 }
  0x3b   :  { %s749_s8 = scalar_lea.vmem %s79_s30, 1024  ;;  %p754_p12 = scmp.lt.s32.totalorder %s79_s30, %s79_s30 }
  0x3c   :  { %p750_p11 = scmp.ne.s32.totalorder %s79_s30, %s749_s8  ;;  %p755_p13 = scmp.lt.s32.totalorder %s749_s8, %s749_s8 }
  0x3e   :  { %p756_p0 = por %p755_p13, %p754_p12 }
  0x40   :  { %p757_p1 = pnand %p756_p0, %p750_p11 }
  0x42   :  { %760 = shalt.err (!%p757_p1)
}
  0x43   :  { %84 = dma.hbm_to_vmem [thread:$0]  %s918_s5, 1024, %s79_s30, [#allocation12], %s792_s27, %s792_s27, %s793_s28  }
  0x44   :  { %781 = dma.done.wait [#allocation3], 256  }
  0x45   :  { %782 = vsyncadd [#allocation3], 4294967040 }
  0x46   :  { %783 = dma.done.wait [#allocation6], 1152  }
  0x47   :  { %784 = vsyncadd [#allocation6], 4294966144 }
  0x48   :  { %785 = dma.done.wait [#allocation9], 1152  }
  0x49   :  { %786 = vsyncadd [#allocation9], 4294966144 }
  0x4a   :  { %787 = dma.done.wait [#allocation12], 1024  }
  0x4b   :  { %788 = vsyncadd [#allocation12], 4294966272  ;;  %v801_v0 = vmov 0.0   ;;  %vm802_vm0 = vmmov 0   ;;  %v609_v1 = vld [vmem:[#allocation5 + $0x38] sm:$0xff]   ;;  %v610_v2 = vld [vmem:[#allocation5 + $0x30] sm:$0xff]  }
  0x4c   :  { %536 = vmatprep.subr.bf16.mxu0 %v801_v0  ;;  %552 = vmatprep.mubr.msk.bf16.mxu0 %vm802_vm0, %v801_v0  ;;  %v611_v3 = vld [vmem:[#allocation5 + $0x28] sm:$0xff]   ;;  %v612_v4 = vld [vmem:[#allocation5 + $0x20] sm:$0xff]   ;;  %v613_v5 = vld [vmem:[#allocation5 + $0x18] sm:$0xff]   ;;  %s803_s27 = smov [#allocation13]  }
  0x4d   :  { %556 = vmatprep.subr.bf16.mxu1 %v801_v0  ;;  %572 = vmatprep.mubr.msk.bf16.mxu1 %vm802_vm0, %v801_v0  ;;  %v614_v6 = vld [vmem:[#allocation5 + $0x10] sm:$0xff]   ;;  %v615_v7 = vld [vmem:[#allocation5 + $0x8] sm:$0xff]   ;;  %v616_v8 = vld [vmem:[#allocation5] sm:$0xff]   ;;  %s465_s28 = sshll.u32 %s803_s27, 4  ;;  %s466_s28 = int_to_ptr.vmem [resolvable:$true] %s465_s28 }
  0x4e   :  { %537 = vmatpush3.bf16.msra.mxu0 %v609_v1  ;;  %v158_v9 = vld [vmem:[#allocation2] sm:$0xff]  ;;  %v159_v10 = vld [vmem:[#allocation2 + $0x8] sm:$0xff]  ;;  %v617_v12 = vld [vmem:[#allocation8 + $0x38] sm:$0xff]   ;;  %s761_s10 = scalar_lea.vmem %s466_s28, 256  ;;  %p766_p3 = scmp.lt.s32.totalorder %s466_s28, %s466_s28 }
  0x4f   :  { %538 = vmatprep.subr.bf16.mxu0 %v801_v0  ;;  %v160_v11 = vpack.c.bf16 %v159_v10, %v158_v9  ;;  %557 = vmatpush3.bf16.msra.mxu1 %v617_v12  ;;  %v618_v13 = vld [vmem:[#allocation8 + $0x30] sm:$0xff]   ;;  %v619_v14 = vld [vmem:[#allocation8 + $0x28] sm:$0xff]   ;;  %v620_v15 = vld [vmem:[#allocation8 + $0x20] sm:$0xff]   ;;  %p762_p2 = scmp.ne.s32.totalorder %s466_s28, %s761_s10  ;;  %p767_p4 = scmp.lt.s32.totalorder %s761_s10, %s761_s10 }
  0x50   :  { %558 = vmatprep.subr.bf16.mxu1 %v801_v0  ;;  %v621_v16 = vld [vmem:[#allocation8 + $0x18] sm:$0xff]   ;;  %v622_v17 = vld [vmem:[#allocation8 + $0x10] sm:$0xff]   ;;  %v623_v18 = vld [vmem:[#allocation8 + $0x8] sm:$0xff]  }
  0x51   :  { %v624_v19 = vld [vmem:[#allocation8] sm:$0xff]   ;;  %v480_v21 = vld [vmem:[#allocation7] ss:$0 sm:$0xff]  ;;  %v627_v36 = vld [vmem:[#allocation11 + $0x28] sm:$0xff]   ;;  %p768_p5 = por %p767_p4, %p766_p3 }
  0x52   :  { %539 = vmatpush3.bf16.msra.mxu0 %v610_v2  ;;  %v625_v34 = vld [vmem:[#allocation11 + $0x38] sm:$0xff]   ;;  %v626_v35 = vld [vmem:[#allocation11 + $0x30] sm:$0xff]   ;;  %v628_v37 = vld [vmem:[#allocation11 + $0x20] sm:$0xff]  }
  0x53   :  { %540 = vmatprep.subr.bf16.mxu0 %v801_v0  ;;  %559 = vmatpush3.bf16.msra.mxu1 %v618_v13  ;;  %v629_v38 = vld [vmem:[#allocation11 + $0x18] sm:$0xff]   ;;  %v630_v39 = vld [vmem:[#allocation11 + $0x10] sm:$0xff]   ;;  %v631_v40 = vld [vmem:[#allocation11 + $0x8] sm:$0xff]   ;;  %p769_p6 = pnand %p768_p5, %p762_p2 }
  0x54   :  { %560 = vmatprep.subr.bf16.mxu1 %v801_v0  ;;  %v632_v41 = vld [vmem:[#allocation11] sm:$0xff]   ;;  %v490_v43 = vld [vmem:[#allocation10] ss:$0 sm:$0xff] }
  0x55   :  { %v500_v56 = vld [vmem:[%s919_s6] ss:$0 sm:$0xff] }
  0x56   :  { %541 = vmatpush3.bf16.msra.mxu0 %v611_v3 }
  0x57   :  { %542 = vmatprep.subr.bf16.mxu0 %v801_v0  ;;  %561 = vmatpush3.bf16.msra.mxu1 %v619_v14 }
  0x58   :  { %562 = vmatprep.subr.bf16.mxu1 %v801_v0 }
  0x5a   :  { %543 = vmatpush3.bf16.msra.mxu0 %v612_v4 }
  0x5b   :  { %544 = vmatprep.subr.bf16.mxu0 %v801_v0  ;;  %563 = vmatpush3.bf16.msra.mxu1 %v620_v15 }
  0x5c   :  { %564 = vmatprep.subr.bf16.mxu1 %v801_v0 }
  0x5e   :  { %545 = vmatpush3.bf16.msra.mxu0 %v613_v5 }
  0x5f   :  { %546 = vmatprep.subr.bf16.mxu0 %v801_v0  ;;  %565 = vmatpush3.bf16.msra.mxu1 %v621_v16 }
  0x60   :  { %566 = vmatprep.subr.bf16.mxu1 %v801_v0 }
  0x62   :  { %547 = vmatpush3.bf16.msra.mxu0 %v614_v6 }
  0x63   :  { %548 = vmatprep.subr.bf16.mxu0 %v801_v0  ;;  %567 = vmatpush3.bf16.msra.mxu1 %v622_v17 }
  0x64   :  { %568 = vmatprep.subr.bf16.mxu1 %v801_v0 }
  0x66   :  { %549 = vmatpush3.bf16.msra.mxu0 %v615_v7 }
  0x67   :  { %550 = vmatprep.subr.bf16.mxu0 %v801_v0  ;;  %569 = vmatpush3.bf16.msra.mxu1 %v623_v18 }
  0x68   :  { %570 = vmatprep.subr.bf16.mxu1 %v801_v0 }
  0x6a   :  { %551 = vmatpush3.bf16.msra.mxu0 %v616_v8 }
  0x6b   :  { %576 = vmatprep.subr.bf16.mxu0 %v801_v0  ;;  %571 = vmatpush3.bf16.msra.mxu1 %v624_v19 }
  0x6d   :  { %553 = vmatmul.mubr.bf16.vlgmr.msra.gmra.mxu0 %v160_v11 }
  0x6e   :  { %592 = vmatprep.mubr.msk.bf16.mxu0 %vm802_vm0, %v801_v0  ;;  %577 = vmatpush3.bf16.msra.mxu0 %v625_v34 }
  0x6f   :  { %578 = vmatprep.subr.bf16.mxu0 %v801_v0 }
  0x72   :  { %579 = vmatpush3.bf16.msra.mxu0 %v626_v35 }
  0x73   :  { %580 = vmatprep.subr.bf16.mxu0 %v801_v0 }
  0x76   :  { %581 = vmatpush3.bf16.msra.mxu0 %v627_v36 }
  0x77   :  { %582 = vmatprep.subr.bf16.mxu0 %v801_v0 }
  0x7a   :  { %583 = vmatpush3.bf16.msra.mxu0 %v628_v37 }
  0x7b   :  { %584 = vmatprep.subr.bf16.mxu0 %v801_v0 }
  0x7e   :  { %585 = vmatpush3.bf16.msra.mxu0 %v629_v38 }
  0x7f   :  { %586 = vmatprep.subr.bf16.mxu0 %v801_v0 }
  0x82   :  { %587 = vmatpush3.bf16.msra.mxu0 %v630_v39 }
  0x83   :  { %588 = vmatprep.subr.bf16.mxu0 %v801_v0 }
  0x86   :  { %589 = vmatpush3.bf16.msra.mxu0 %v631_v40 }
  0x87   :  { %590 = vmatprep.subr.bf16.mxu0 %v801_v0 }
  0x8a   :  { %591 = vmatpush3.bf16.msra.mxu0 %v632_v41 }
 0x12d   :  { %v247_v20 = vpop.f32.mrf.mxu0 }
 0x12e   :  { %v248_v24 = vadd.f32 %v480_v21, %v247_v20 }
 0x12f   :  { %v554_v22 = vpop.f32.mrf.mxu0 }
 0x131   :  { %v250_v23 = vpop.f32.mrf.mxu0 }
 0x132   :  { %v251_v25 = vadd.f32 %v480_v21, %v250_v23 }
 0x133   :  { %v555_v26 = vpop.f32.mrf.mxu0 }
 0x134   :  { %v254_v27 = vpack.c.bf16 %v251_v25, %v248_v24 }
 0x136   :  { %v489_v28 = vmul.bf16 3216621497, %v254_v27 }
 0x138   :  { %633 = vpow.bf16 %v489_v28 }
 0x146   :  { %v634_v29 = vpop.eup %633 }
 0x147   :  { %v259_v30 = vadd.bf16 1065369472, %v634_v29 }
 0x149   :  { %635 = vrcp.bf16 %v259_v30 }
 0x157   :  { %v636_v31 = vpop.eup %635 }
 0x158   :  { %v261_v32 = vmul.bf16 1065369472, %v636_v31 }
 0x15a   :  { %v262_v33 = vmul.bf16 %v261_v32, %v254_v27 }
 0x15c   :  { %573 = vmatmul.mubr.bf16.vlgmr.msra.gmra.mxu1 %v262_v33 }
 0x21c   :  { %v349_v42 = vpop.f32.mrf.mxu1 }
 0x21d   :  { %v350_v46 = vadd.f32 %v490_v43, %v349_v42 }
 0x21e   :  { %v574_v44 = vpop.f32.mrf.mxu1 }
 0x220   :  { %v352_v45 = vpop.f32.mrf.mxu1 }
 0x221   :  { %v353_v47 = vadd.f32 %v490_v43, %v352_v45 }
 0x222   :  { %v575_v48 = vpop.f32.mrf.mxu1 }
 0x223   :  { %v356_v49 = vpack.c.bf16 %v353_v47, %v350_v46 }
 0x225   :  { %v499_v50 = vmul.bf16 3216621497, %v356_v49 }
 0x227   :  { %637 = vpow.bf16 %v499_v50 }
 0x235   :  { %v638_v51 = vpop.eup %637 }
 0x236   :  { %v361_v52 = vadd.bf16 1065369472, %v638_v51 }
 0x238   :  { %639 = vrcp.bf16 %v361_v52 }
 0x246   :  { %v640_v53 = vpop.eup %639 }
 0x247   :  { %v363_v54 = vmul.bf16 1065369472, %v640_v53 }
 0x249   :  { %v364_v55 = vmul.bf16 %v363_v54, %v356_v49 }
 0x24b   :  { %593 = vmatmul.mubr.bf16.vlgmr.msra.gmra.mxu0 %v364_v55 }
 0x30b   :  { %v451_v57 = vpop.f32.mrf.mxu0 }
 0x30c   :  { %v452_v58 = vadd.f32 %v500_v56, %v451_v57 }
 0x30d   :  { %v594_v59 = vpop.f32.mrf.mxu0 }
 0x30e   :  { %458 = vst [vmem:[#allocation13] sm:$0xff] %v452_v58 }
 0x30f   :  { %v454_v60 = vpop.f32.mrf.mxu0 }
 0x310   :  { %v455_v61 = vadd.f32 %v500_v56, %v454_v60 }
 0x311   :  { %v595_v62 = vpop.f32.mrf.mxu0 }
 0x312   :  { %459 = vst [vmem:[#allocation13 + $0x8] sm:$0xff] %v455_v61 }
 0x313   :  { %772 = shalt.err (!%p769_p6)
}
 0x314   :  { %471 = dma.vmem_to_hbm [thread:$0]  %s466_s28, 256, %s920_s7, [#allocation4], %s796_s15, %s796_s15, %s797_s16  }
 0x315   :  { %789 = dma.done.wait [#allocation4], 256  }
 0x316   :  { %790 = vsyncadd [#allocation4], 4294967040 }
 0x317   :  { %475 = vsyncpa [#allocation3], 1 }
 0x318   :  { %476 = vsyncpa [#allocation6], 1 }
 0x319   :  { %477 = vsyncpa [#allocation9], 1 }
 0x31a   :  { %478 = vsyncpa [#allocation12], 1 }
 0x31b   :  { %479 = vsyncpa [#allocation4], 1 }

</bundles_post_ra>
